<compile_context>
chip_gen: v7x
topology: tpu7x:2x2x1
jax: 0.10.0
libtpu: 0.0.40
codegen_flags: <defaults>
</compile_context>

<pallas_src>
import jax
import jax.numpy as jnp
from jax import lax
from jax.experimental import pallas as pl
from jax.experimental.pallas import tpu as pltpu

_CPAD = 8  # channel slots per tap (sublane-aligned)


def _make_style_loss_kernel(batch, hidden, num_domains, style_dim,
                            p_pad, npad, margin, wp):
    """Builds the fused loss kernel for static shape parameters."""

    def kernel(xflat_ref, w_conv_ref, b_conv_ref, mask_ref,
               w_head_ref, b_head_ref, y_rep_ref, s_x_ref,
               out_ref, taps_ref, h_ref):
        # ---- in-kernel im2col: nine statically shifted lane slices of the
        #      flat, zero-padded image.  Channels are pre-padded to 8 rows in
        #      the wrapper, so each store is a full aligned 8-sublane tile
        #      (no masked stores, no zeroing pass).  Zero-padded channel rows
        #      meet zero columns in w_conv_taps, contributing exactly 0.
        for ky in range(3):
            for kx in range(3):
                t = ky * 3 + kx
                off = margin + (ky - 1) * wp + (kx - 1)     # static lane offset >= 0
                taps_ref[t * _CPAD:(t + 1) * _CPAD, :] = xflat_ref[:, off:off + npad]

        # ---- conv3x3 as a single MXU matmul: bf16 inputs, f32 accumulation.
        taps = taps_ref[...].astype(jnp.bfloat16)                      # [72, NPAD]
        conv = jnp.dot(w_conv_ref[...], taps,
                       preferred_element_type=jnp.float32)             # [HIDDEN, NPAD]
        feat = jnp.maximum(conv + b_conv_ref[...], 0.0)                # bias+ReLU, f32

        # ---- global average pool: mask holds 1/(H*W) at valid pixels, 0 at
        #      the padding ring / alignment tail; per-image lane sum.
        feat = feat * mask_ref[...]                                    # [HIDDEN, NPAD]
        for bb in range(batch):
            h_ref[:, bb:bb + 1] = jnp.sum(
                feat[:, bb * p_pad:(bb + 1) * p_pad], axis=-1, keepdims=True)

        # ---- all per-domain heads fused into ONE matmul, blended with y (VPU).
        heads = jnp.dot(w_head_ref[...], h_ref[...].astype(jnp.bfloat16),
                        preferred_element_type=jnp.float32)            # [D*S, B]
        heads = (heads + b_head_ref[...]) * y_rep_ref[...]             # bias + blend
        e_x = jnp.zeros((style_dim, batch), jnp.float32)
        for d in range(num_domains):
            e_x = e_x + heads[d * style_dim:(d + 1) * style_dim, :]    # [S, B]

        # ---- L1 loss with mean reduction (torch.nn.L1Loss default).
        out_ref[...] = jnp.mean(jnp.abs(e_x - s_x_ref[...]), keepdims=True)

    return kernel


def style_reconstruction_loss(x, y, s_x, params):
    """x: [B, C, H, W] (NCHW), y: [B, num_domains], s_x: [B, style_dim]."""
    b, c, h, w = x.shape
    assert c <= _CPAD, "channel slots are padded to 8 per tap"
    hp, wp = h + 2, w + 2
    p = hp * wp                               # padded pixels per image
    p_pad = ((p + 127) // 128) * 128          # lane-tile aligned per-image block
    npad = b * p_pad                          # total lane extent (pixels on lanes)
    margin = wp + 1                           # max |tap shift| in the flat layout

    w_conv = params["w_conv"]                                   # [C*9, HIDDEN]
    hidden = w_conv.shape[1]
    w_head = params["w_head"]                                   # [D, HIDDEN, S]
    num_domains, _, style_dim = w_head.shape

    # ---- layout plumbing (cheap; no 9x im2col expansion in HBM) -------------
    # Flat zero-padded image with channel rows padded to 8 so in-kernel tap
    # stores are full aligned sublane tiles.
    xp = jnp.pad(x.astype(jnp.float32),
                 ((0, 0), (0, _CPAD - c), (1, 1), (1, 1)))      # [B, 8, Hp, Wp]
    xp = xp.transpose(1, 0, 2, 3).reshape(_CPAD, b, p)          # [8, B, P]
    xp = jnp.pad(xp, ((0, 0), (0, 0), (0, p_pad - p))).reshape(_CPAD, npad)
    xflat = jnp.pad(xp, ((0, 0), (margin, margin)))             # [8, margin+NPAD+margin]

    # conv weights re-ordered to the stacked-tap row layout (row = t*8 + c)
    wt = w_conv.reshape(c, 9, hidden).transpose(2, 1, 0)        # [HIDDEN, 9, C]
    wt = jnp.pad(wt, ((0, 0), (0, 0), (0, _CPAD - c)))          # [HIDDEN, 9, 8]
    w_conv_taps = wt.reshape(hidden, 9 * _CPAD).astype(jnp.bfloat16)

    b_conv_col = params["b_conv"].reshape(hidden, 1).astype(jnp.float32)

    # pooling mask: 1/(H*W) at valid pixels of each image's flat block, else 0
    m2d = jnp.zeros((hp, wp), jnp.float32).at[1:h + 1, 1:w + 1].set(1.0 / (h * w))
    mvec = jnp.pad(m2d.reshape(-1), (0, p_pad - p))             # [P_pad]
    mask = jnp.tile(mvec, (b,)).reshape(1, npad)                # [1, NPAD]

    # fused head weights / bias / one-hot blend (row index = d*S + s)
    w_head_t = w_head.transpose(0, 2, 1).reshape(
        num_domains * style_dim, hidden).astype(jnp.bfloat16)   # [D*S, HIDDEN]
    b_head_col = params["b_head"].reshape(
        num_domains * style_dim, 1).astype(jnp.float32)         # [D*S, 1]
    y_rep = jnp.repeat(y.astype(jnp.float32).T, style_dim, axis=0)  # [D*S, B]
    s_x_t = s_x.astype(jnp.float32).T                               # [S, B]

    kernel = _make_style_loss_kernel(b, hidden, num_domains, style_dim,
                                     p_pad, npad, margin, wp)
    vmem = pl.BlockSpec(memory_space=pltpu.MemorySpace.VMEM)
    loss = pl.pallas_call(
        kernel,
        out_shape=jax.ShapeDtypeStruct((1, 1), jnp.float32),
        in_specs=[vmem] * 8,
        out_specs=vmem,
        scratch_shapes=[pltpu.VMEM((9 * _CPAD, npad), jnp.float32),  # stacked taps
                        pltpu.VMEM((hidden, b), jnp.float32)],       # pooled features
    )(xflat, w_conv_taps, b_conv_col, mask,
      w_head_t, b_head_col, y_rep, s_x_t)
    return loss[0, 0]


def reference_loss(x, y, s_x, params):
    """Pure-JAX reference (conv via lax.conv) for numerical verification."""
    c = x.shape[1]
    hidden = params["w_conv"].shape[1]
    kernel = params["w_conv"].T.reshape(hidden, c, 3, 3)        # OIHW
    conv = lax.conv_general_dilated(
        x, kernel, (1, 1), "SAME",
        dimension_numbers=("NCHW", "OIHW", "NCHW"))
    conv = conv + params["b_conv"].reshape(1, hidden, 1, 1)
    feat = jnp.maximum(conv, 0.0)
    h = feat.mean(axis=(2, 3))                                  # [B, HIDDEN]
    heads = jnp.einsum("bh,dhs->bds", h, params["w_head"]) + params["b_head"][None]
    e_x = jnp.einsum("bd,bds->bs", y, heads)                    # [B, STYLE]
    return jnp.mean(jnp.abs(e_x - s_x))


if __name__ == "__main__":
    B, C, H, W = 2, 3, 16, 16
    HIDDEN, NUM_DOMAINS, STYLE_DIM = 32, 4, 16

    key = jax.random.PRNGKey(0)
    k_x, k_s, k_wc, k_bc, k_wh, k_bh = jax.random.split(key, 6)

    x = jax.random.normal(k_x, (B, C, H, W), jnp.float32)           # image, NCHW
    y = jax.nn.one_hot(jnp.array([1, 3]), NUM_DOMAINS,
                       dtype=jnp.float32)                            # [B, D] 2-D
    s_x = jax.random.normal(k_s, (B, STYLE_DIM), jnp.float32)        # [B, S] 2-D

    params = dict(
        w_conv=0.1 * jax.random.normal(k_wc, (C * 9, HIDDEN), jnp.float32),
        b_conv=0.1 * jax.random.normal(k_bc, (HIDDEN,), jnp.float32),
        w_head=0.1 * jax.random.normal(k_wh, (NUM_DOMAINS, HIDDEN, STYLE_DIM),
                                       jnp.float32),
        b_head=0.1 * jax.random.normal(k_bh, (NUM_DOMAINS, STYLE_DIM),
                                       jnp.float32),
    )

    loss = jax.block_until_ready(style_reconstruction_loss(x, y, s_x, params))
    ref = jax.block_until_ready(reference_loss(x, y, s_x, params))
    assert jnp.allclose(loss, ref, rtol=1e-2, atol=1e-3), (loss, ref)
    print("KERNEL_OK")
</pallas_src>

<mosaic_0001>
module attributes {stable_mosaic.version = 11 : i64} {
  func.func @kernel(%arg0: memref<8x806xf32, #tpu.memory_space<vmem>>, %arg1: memref<32x72xbf16, #tpu.memory_space<vmem>>, %arg2: memref<32x1xf32, #tpu.memory_space<vmem>>, %arg3: memref<1x768xf32, #tpu.memory_space<vmem>>, %arg4: memref<64x32xbf16, #tpu.memory_space<vmem>>, %arg5: memref<64x1xf32, #tpu.memory_space<vmem>>, %arg6: memref<64x2xf32, #tpu.memory_space<vmem>>, %arg7: memref<16x2xf32, #tpu.memory_space<vmem>>, %arg8: memref<1x1xf32, #tpu.memory_space<vmem>>, %arg9: memref<72x768xf32, #tpu.memory_space<vmem>>, %arg10: memref<32x2xf32, #tpu.memory_space<vmem>>) attributes {dimension_semantics = [], scalar_prefetch = 0 : i64, scratch_operands = 2 : i64, tpu.core_type = #tpu.core_type<tc>} {
    %c0 = arith.constant 0 : index
    %c0_0 = arith.constant 0 : index
    %0 = vector.load %arg0[%c0, %c0_0] : memref<8x806xf32, #tpu.memory_space<vmem>>, vector<8x768xf32>
    %c0_1 = arith.constant 0 : index
    %c0_2 = arith.constant 0 : index
    %1 = vector.load %arg9[%c0_1, %c0_2] : memref<72x768xf32, #tpu.memory_space<vmem>>, vector<8x768xf32>
    tpu.vector_store %arg9[%c0_1, %c0_2], %0 {strides = array<i32>} : memref<72x768xf32, #tpu.memory_space<vmem>>, vector<8x768xf32>,
    %c0_3 = arith.constant 0 : index
    %c1 = arith.constant 1 : index
    %2 = vector.load %arg0[%c0_3, %c1] : memref<8x806xf32, #tpu.memory_space<vmem>>, vector<8x768xf32>
    %c8 = arith.constant 8 : index
    %c0_4 = arith.constant 0 : index
    %3 = vector.load %arg9[%c8, %c0_4] : memref<72x768xf32, #tpu.memory_space<vmem>>, vector<8x768xf32>
    tpu.vector_store %arg9[%c8, %c0_4], %2 {strides = array<i32>} : memref<72x768xf32, #tpu.memory_space<vmem>>, vector<8x768xf32>,
    %c0_5 = arith.constant 0 : index
    %c2 = arith.constant 2 : index
    %4 = vector.load %arg0[%c0_5, %c2] : memref<8x806xf32, #tpu.memory_space<vmem>>, vector<8x768xf32>
    %c16 = arith.constant 16 : index
    %c0_6 = arith.constant 0 : index
    %5 = vector.load %arg9[%c16, %c0_6] : memref<72x768xf32, #tpu.memory_space<vmem>>, vector<8x768xf32>
    tpu.vector_store %arg9[%c16, %c0_6], %4 {strides = array<i32>} : memref<72x768xf32, #tpu.memory_space<vmem>>, vector<8x768xf32>,
    %c0_7 = arith.constant 0 : index
    %c18 = arith.constant 18 : index
    %6 = vector.load %arg0[%c0_7, %c18] : memref<8x806xf32, #tpu.memory_space<vmem>>, vector<8x768xf32>
    %c24 = arith.constant 24 : index
    %c0_8 = arith.constant 0 : index
    %7 = vector.load %arg9[%c24, %c0_8] : memref<72x768xf32, #tpu.memory_space<vmem>>, vector<8x768xf32>
    tpu.vector_store %arg9[%c24, %c0_8], %6 {strides = array<i32>} : memref<72x768xf32, #tpu.memory_space<vmem>>, vector<8x768xf32>,
    %c0_9 = arith.constant 0 : index
    %c19 = arith.constant 19 : index
    %8 = vector.load %arg0[%c0_9, %c19] : memref<8x806xf32, #tpu.memory_space<vmem>>, vector<8x768xf32>
    %c32 = arith.constant 32 : index
    %c0_10 = arith.constant 0 : index
    %9 = vector.load %arg9[%c32, %c0_10] : memref<72x768xf32, #tpu.memory_space<vmem>>, vector<8x768xf32>
    tpu.vector_store %arg9[%c32, %c0_10], %8 {strides = array<i32>} : memref<72x768xf32, #tpu.memory_space<vmem>>, vector<8x768xf32>,
    %c0_11 = arith.constant 0 : index
    %c20 = arith.constant 20 : index
    %10 = vector.load %arg0[%c0_11, %c20] : memref<8x806xf32, #tpu.memory_space<vmem>>, vector<8x768xf32>
    %c40 = arith.constant 40 : index
    %c0_12 = arith.constant 0 : index
    %11 = vector.load %arg9[%c40, %c0_12] : memref<72x768xf32, #tpu.memory_space<vmem>>, vector<8x768xf32>
    tpu.vector_store %arg9[%c40, %c0_12], %10 {strides = array<i32>} : memref<72x768xf32, #tpu.memory_space<vmem>>, vector<8x768xf32>,
    %c0_13 = arith.constant 0 : index
    %c36 = arith.constant 36 : index
    %12 = vector.load %arg0[%c0_13, %c36] : memref<8x806xf32, #tpu.memory_space<vmem>>, vector<8x768xf32>
    %c48 = arith.constant 48 : index
    %c0_14 = arith.constant 0 : index
    %13 = vector.load %arg9[%c48, %c0_14] : memref<72x768xf32, #tpu.memory_space<vmem>>, vector<8x768xf32>
    tpu.vector_store %arg9[%c48, %c0_14], %12 {strides = array<i32>} : memref<72x768xf32, #tpu.memory_space<vmem>>, vector<8x768xf32>,
    %c0_15 = arith.constant 0 : index
    %c37 = arith.constant 37 : index
    %14 = vector.load %arg0[%c0_15, %c37] : memref<8x806xf32, #tpu.memory_space<vmem>>, vector<8x768xf32>
    %c56 = arith.constant 56 : index
    %c0_16 = arith.constant 0 : index
    %15 = vector.load %arg9[%c56, %c0_16] : memref<72x768xf32, #tpu.memory_space<vmem>>, vector<8x768xf32>
    tpu.vector_store %arg9[%c56, %c0_16], %14 {strides = array<i32>} : memref<72x768xf32, #tpu.memory_space<vmem>>, vector<8x768xf32>,
    %c0_17 = arith.constant 0 : index
    %c38 = arith.constant 38 : index
    %16 = vector.load %arg0[%c0_17, %c38] : memref<8x806xf32, #tpu.memory_space<vmem>>, vector<8x768xf32>
    %c64 = arith.constant 64 : index
    %c0_18 = arith.constant 0 : index
    %17 = vector.load %arg9[%c64, %c0_18] : memref<72x768xf32, #tpu.memory_space<vmem>>, vector<8x768xf32>
    tpu.vector_store %arg9[%c64, %c0_18], %16 {strides = array<i32>} : memref<72x768xf32, #tpu.memory_space<vmem>>, vector<8x768xf32>,
    %c0_19 = arith.constant 0 : index
    %c0_20 = arith.constant 0 : index
    %18 = vector.load %arg9[%c0_19, %c0_20] : memref<72x768xf32, #tpu.memory_space<vmem>>, vector<72x768xf32>
    %19 = arith.truncf %18 : vector<72x768xf32> to vector<72x768xbf16>
    %c0_21 = arith.constant 0 : index
    %c0_22 = arith.constant 0 : index
    %20 = vector.load %arg1[%c0_21, %c0_22] : memref<32x72xbf16, #tpu.memory_space<vmem>>, vector<32x72xbf16>
    %cst = arith.constant dense<0.000000e+00> : vector<32x768xf32>
    %21 = tpu.matmul %20, %19, %cst {dimension_numbers = #tpu.dot_dimension_numbers<[1], [0], [0], [1], [0, 0, 1, 1], [], []>} : vector<32x72xbf16>, vector<72x768xbf16>, vector<32x768xf32> -> vector<32x768xf32>
    %c0_23 = arith.constant 0 : index
    %c0_24 = arith.constant 0 : index
    %22 = vector.load %arg2[%c0_23, %c0_24] : memref<32x1xf32, #tpu.memory_space<vmem>>, vector<32x1xf32>
    %23 = vector.broadcast %22 : vector<32x1xf32> to vector<32x768xf32>
    %24 = arith.addf %21, %23 : vector<32x768xf32>
    %cst_25 = arith.constant 0.000000e+00 : f32
    %25 = vector.broadcast %cst_25 : f32 to vector<32x768xf32>
    %26 = arith.maximumf %24, %25 : vector<32x768xf32>
    %c0_26 = arith.constant 0 : index
    %c0_27 = arith.constant 0 : index
    %27 = vector.load %arg3[%c0_26, %c0_27] : memref<1x768xf32, #tpu.memory_space<vmem>>, vector<1x768xf32>
    %28 = vector.broadcast %27 : vector<1x768xf32> to vector<32x768xf32>
    %29 = arith.mulf %26, %28 : vector<32x768xf32>
    %30 = vector.extract_strided_slice %29 {offsets = [0, 0], sizes = [32, 384], strides = [1, 1]} : vector<32x768xf32> to vector<32x384xf32>
    %cst_28 = arith.constant dense<0.000000e+00> : vector<32xf32>
    %31 = vector.multi_reduction <add>, %30, %cst_28 [1] : vector<32x384xf32> to vector<32xf32>
    %32 = vector.shape_cast %31 : vector<32xf32> to vector<32x1xf32>
    %c0_29 = arith.constant 0 : index
    %c0_30 = arith.constant 0 : index
    %33 = vector.load %arg10[%c0_29, %c0_30] : memref<32x2xf32, #tpu.memory_space<vmem>>, vector<32x1xf32>
    tpu.vector_store %arg10[%c0_29, %c0_30], %32 {strides = array<i32>} : memref<32x2xf32, #tpu.memory_space<vmem>>, vector<32x1xf32>,
    %34 = vector.extract_strided_slice %29 {offsets = [0, 384], sizes = [32, 384], strides = [1, 1]} : vector<32x768xf32> to vector<32x384xf32>
    %cst_31 = arith.constant dense<0.000000e+00> : vector<32xf32>
    %35 = vector.multi_reduction <add>, %34, %cst_31 [1] : vector<32x384xf32> to vector<32xf32>
    %36 = vector.shape_cast %35 : vector<32xf32> to vector<32x1xf32>
    %c0_32 = arith.constant 0 : index
    %c1_33 = arith.constant 1 : index
    %37 = vector.load %arg10[%c0_32, %c1_33] : memref<32x2xf32, #tpu.memory_space<vmem>>, vector<32x1xf32>
    tpu.vector_store %arg10[%c0_32, %c1_33], %36 {strides = array<i32>} : memref<32x2xf32, #tpu.memory_space<vmem>>, vector<32x1xf32>,
    %c0_34 = arith.constant 0 : index
    %c0_35 = arith.constant 0 : index
    %38 = vector.load %arg4[%c0_34, %c0_35] : memref<64x32xbf16, #tpu.memory_space<vmem>>, vector<64x32xbf16>
    %c0_36 = arith.constant 0 : index
    %c0_37 = arith.constant 0 : index
    %39 = vector.load %arg10[%c0_36, %c0_37] : memref<32x2xf32, #tpu.memory_space<vmem>>, vector<32x2xf32>
    %40 = arith.truncf %39 : vector<32x2xf32> to vector<32x2xbf16>
    %cst_38 = arith.constant dense<0.000000e+00> : vector<64x2xf32>
    %41 = tpu.matmul %38, %40, %cst_38 {dimension_numbers = #tpu.dot_dimension_numbers<[1], [0], [0], [1], [0, 0, 1, 1], [], []>} : vector<64x32xbf16>, vector<32x2xbf16>, vector<64x2xf32> -> vector<64x2xf32>
    %c0_39 = arith.constant 0 : index
    %c0_40 = arith.constant 0 : index
    %42 = vector.load %arg5[%c0_39, %c0_40] : memref<64x1xf32, #tpu.memory_space<vmem>>, vector<64x1xf32>
    %43 = vector.broadcast %42 : vector<64x1xf32> to vector<64x2xf32>
    %44 = arith.addf %41, %43 : vector<64x2xf32>
    %c0_41 = arith.constant 0 : index
    %c0_42 = arith.constant 0 : index
    %45 = vector.load %arg6[%c0_41, %c0_42] : memref<64x2xf32, #tpu.memory_space<vmem>>, vector<64x2xf32>
    %46 = arith.mulf %44, %45 : vector<64x2xf32>
    %cst_43 = arith.constant 0.000000e+00 : f32
    %47 = vector.broadcast %cst_43 : f32 to vector<16x2xf32>
    %48 = vector.extract_strided_slice %46 {offsets = [0, 0], sizes = [16, 2], strides = [1, 1]} : vector<64x2xf32> to vector<16x2xf32>
    %49 = arith.addf %47, %48 : vector<16x2xf32>
    %50 = vector.extract_strided_slice %46 {offsets = [16, 0], sizes = [16, 2], strides = [1, 1]} : vector<64x2xf32> to vector<16x2xf32>
    %51 = arith.addf %49, %50 : vector<16x2xf32>
    %52 = vector.extract_strided_slice %46 {offsets = [32, 0], sizes = [16, 2], strides = [1, 1]} : vector<64x2xf32> to vector<16x2xf32>
    %53 = arith.addf %51, %52 : vector<16x2xf32>
    %54 = vector.extract_strided_slice %46 {offsets = [48, 0], sizes = [16, 2], strides = [1, 1]} : vector<64x2xf32> to vector<16x2xf32>
    %55 = arith.addf %53, %54 : vector<16x2xf32>
    %c0_44 = arith.constant 0 : index
    %c0_45 = arith.constant 0 : index
    %56 = vector.load %arg7[%c0_44, %c0_45] : memref<16x2xf32, #tpu.memory_space<vmem>>, vector<16x2xf32>
    %57 = arith.subf %55, %56 : vector<16x2xf32>
    %58 = math.absf %57 : vector<16x2xf32>
    %59 = vector.shape_cast %58 : vector<16x2xf32> to vector<1x16x2xf32>
    %cst_46 = arith.constant dense<0.000000e+00> : vector<1xf32>
    %60 = vector.multi_reduction <add>, %59, %cst_46 [1, 2] : vector<1x16x2xf32> to vector<1xf32>
    %61 = vector.shape_cast %60 : vector<1xf32> to vector<1x1x1xf32>
    %62 = vector.extract %61[0, 0, 0] : f32 from vector<1x1x1xf32>
    %63 = vector.broadcast %62 : f32 to vector<1x1xf32>
    %cst_47 = arith.constant 3.200000e+01 : f32
    %64 = vector.broadcast %cst_47 : f32 to vector<1x1xf32>
    %65 = arith.divf %63, %64 : vector<1x1xf32>
    %c0_48 = arith.constant 0 : index
    %c0_49 = arith.constant 0 : index
    %66 = vector.load %arg8[%c0_48, %c0_49] : memref<1x1xf32, #tpu.memory_space<vmem>>, vector<1x1xf32>
    tpu.vector_store %arg8[%c0_48, %c0_49], %65 {strides = array<i32>} : memref<1x1xf32, #tpu.memory_space<vmem>>, vector<1x1xf32>,
    return
  }
}

</mosaic_0001>

<bundles_post_ra>
// kernel: tpu_custom_call.1
= control target key start
LH: loop header
LB: loop body
LE: loop exit
PB: predicated region body
PF: predicated region fallthrough
CT: control target
= control target key end

     0   :  { %s1271_s13 = smov 126   ;;  %s1272_s14 = smov 127   ;;  %s1736_s0 = inlined_call_operand.vmem [shape: f32[8,806], index: 0, kind: input, shape index: {}]   ;;  %s1737_s1 = inlined_call_operand.vmem [shape: bf16[32,72], index: 1, kind: input, shape index: {}]   ;;  %s1738_s2 = inlined_call_operand.vmem [shape: f32[32,1], index: 2, kind: input, shape index: {}]   ;;  %s1739_s3 = inlined_call_operand.vmem [shape: f32[1,768], index: 3, kind: input, shape index: {}]   ;;  %s1740_s4 = inlined_call_operand.vmem [shape: bf16[64,32], index: 4, kind: input, shape index: {}]   ;;  %s1741_s5 = inlined_call_operand.vmem [shape: f32[64,1], index: 5, kind: input, shape index: {}]   ;;  %s1742_s6 = inlined_call_operand.vmem [shape: f32[64,2], index: 6, kind: input, shape index: {}]   ;;  %s1743_s7 = inlined_call_operand.vmem [shape: f32[16,2], index: 7, kind: input, shape index: {}]   ;;  %s1744_s8 = inlined_call_operand.hbm [shape: f32[1,1], index: 8, kind: output, shape index: {}]  }
   0x1   :  { %v1329_v0 = vld [vmem:[%s1736_s0 + $0x8] sm:$0xff]  ;;  %v1334_v1 = vld [vmem:[%s1736_s0 + $0x10] sm:$0xff]  ;;  %v1339_v2 = vld [vmem:[%s1736_s0] sm:$0xff]  ;;  %s1273_s15 = smov 110  }
   0x2   :  { %v1129_v3 = vpack.i.bf16 %v1334_v1, %v1329_v0  ;;  %v1346_v4 = vld [vmem:[%s1736_s0 + $0x18] sm:$0xff] }
   0x3   :  { %v1124_v5 = vpack.i.bf16 %v1346_v4, %v1339_v2 }
   0x4   :  { %1130 = vrot.lane.b32.xlu1 %v1129_v3, %s1271_s13  ;;  %1120 = vrot.lane.b32.xlu0 %v1129_v3, %s1272_s14 }
   0x8   :  { %1135 = vrot.lane.b32.xlu1 %v1129_v3, %s1273_s15  ;;  %1125 = vrot.lane.b32.xlu0 %v1124_v5, %s1272_s14 }
   0x9   :  { %13 = vsyncpa [#allocation5], 0  ;;  %s1274_s16 = smov 108   ;;  %s1275_s17 = smov 109   ;;  %v1184_v6 = vpack.i.bf16 %v1329_v0, %v1339_v2  ;;  %v1370_v7 = vld [vmem:[%s1736_s0 + $0x20] sm:$0xff]  ;;  %v1375_v8 = vld [vmem:[%s1736_s0 + $0x28] sm:$0xff] }
   0xa   :  { %s1276_s18 = smov 91   ;;  %s1277_s19 = smov 92   ;;  %v1278_v9 = vmov 0   ;;  %v1189_v10 = vpack.i.bf16 %v1375_v8, %v1370_v7  ;;  %v49_v11 = vld [vmem:[%s1736_s0 + $0x30] sm:$0xff]  ;;  %v1219_v12 = vpack.i.bf16 %v1370_v7, %v1346_v4  ;;  %v508_v14 = vld [vmem:[%s1738_s2 + $0x8] sm:$0xff]  ;;  %v507_v15 = vld [vmem:[%s1738_s2] sm:$0xff] }
   0xb   :  { %599 = vmatprep.mubr.bf16.mxu0 %v1278_v9  ;;  %652 = vmatprep.mubr.bf16.mxu1 %v1278_v9  ;;  %s1279_s24 = smov 90   ;;  %v1224_v13 = vpack.i.bf16 %v49_v11, %v1375_v8  ;;  %v509_v16 = vld [vmem:[%s1738_s2 + $0x10] sm:$0xff]  ;;  %v510_v17 = vld [vmem:[%s1738_s2 + $0x18] sm:$0xff]  ;;  %vm71_vm0 = vcmask 1039360   ;;  %vm118_vm1 = vcmask 1031168   ;;  %vm165_vm2 = vcmask 900096  }
   0xc   :  { %1145 = vrot.lane.b32.xlu1 %v1124_v5, %s1273_s15  ;;  %1140 = vrot.lane.b32.xlu0 %v1124_v5, %s1271_s13  ;;  %vm212_vm3 = vcmask 891904   ;;  %vm259_vm4 = vcmask 883712   ;;  %vm353_vm5 = vcmask 744448   ;;  %vm306_vm6 = vcmask 752640  }
   0xd   :  { %1240 = vset.pattern.permute.xlu1 %v1278_v9  ;;  %1239 = vset.pattern.permute.xlu0 %v1278_v9  ;;  %vm400_vm7 = vcmask 736256   ;;  %vm548_vm8 = vcmask 1043456   ;;  %vm541_vm9 = vcmask 588800   ;;  %vm930_vm10 = vcmask 261120  }
   0xe   :  { %vm822_vm11 = vcmask 7168   ;;  %vm843_vm12 = vcmask 15368   ;;  %vm1038_vm13 = vcmask 15360   ;;  %vm1054_vm14 = vcmask 0  }
  0x10   :  { %1155 = vrot.lane.b32.xlu1 %v1129_v3, %s1274_s16  ;;  %1150 = vrot.lane.b32.xlu0 %v1129_v3, %s1275_s17 }
  0x14   :  { %1165 = vrot.lane.b32.xlu1 %v1124_v5, %s1274_s16  ;;  %1160 = vrot.lane.b32.xlu0 %v1124_v5, %s1275_s17 }
  0x18   :  { %1175 = vrot.lane.b32.xlu1 %v1129_v3, %s1276_s18  ;;  %1170 = vrot.lane.b32.xlu0 %v1129_v3, %s1277_s19 }
  0x1c   :  { %339 = vrot.lane.b32.xlu1 %v1339_v2, %s1276_s18  ;;  %1180 = vrot.lane.b32.xlu0 %v1124_v5, %s1277_s19 }
  0x20   :  { %390 = vrot.lane.b32.xlu1 %v1334_v1, %s1279_s24  ;;  %1185 = vrot.lane.b32.xlu0 %v1184_v6, %s1279_s24 }
  0x24   :  { %69 = vrot.lane.b32.xlu1 %v49_v11, %s1272_s14  ;;  %1190 = vrot.lane.b32.xlu0 %v1189_v10, %s1272_s14 }
  0x28   :  { %1200 = vrot.lane.b32.xlu1 %v1189_v10, %s1273_s15  ;;  %1195 = vrot.lane.b32.xlu0 %v1189_v10, %s1271_s13 }
  0x2c   :  { %163 = vrot.lane.b32.xlu1 %v49_v11, %s1273_s15  ;;  %116 = vrot.lane.b32.xlu0 %v49_v11, %s1271_s13 }
  0x30   :  { %1210 = vrot.lane.b32.xlu1 %v1189_v10, %s1274_s16  ;;  %1205 = vrot.lane.b32.xlu0 %v1189_v10, %s1275_s17 }
  0x34   :  { %257 = vrot.lane.b32.xlu1 %v49_v11, %s1274_s16  ;;  %210 = vrot.lane.b32.xlu0 %v49_v11, %s1275_s17 }
  0x38   :  { %1220 = vrot.lane.b32.xlu1 %v1219_v12, %s1276_s18  ;;  %1215 = vrot.lane.b32.xlu0 %v1189_v10, %s1277_s19 }
  0x3c   :  { %1225 = vrot.lane.b32.xlu1 %v1224_v13, %s1276_s18  ;;  %304 = vrot.lane.b32.xlu0 %v49_v11, %s1277_s19 }
  0x40   :  { %1235 = vrot.lane.b32.xlu1 %v1224_v13, %s1279_s24  ;;  %1230 = vrot.lane.b32.xlu0 %v1219_v12, %s1279_s24 }
  0x44   :  { %518 = vperm.xlu1 %1240, %v508_v14   ;;  %513 = vperm.xlu0 %1239, %v507_v15  }
  0x48   :  { %523 = vperm.xlu1 %1240, %v509_v16   ;;  %528 = vperm.xlu0 %1239, %v510_v17  }
  0x76   :  { %v1416_v18 = vpop.permute.xlu1 %1130  ;;  %v1418_v19 = vpop.permute.xlu0 %1120 }
  0x77   :  { %v1133_v20 = vunpack.i.h.bf16 %v1416_v18  ;;  %v1132_v21 = vunpack.i.l.bf16 %v1416_v18  ;;  %v1123_v22 = vunpack.i.h.bf16 %v1418_v19  ;;  %v1122_v23 = vunpack.i.l.bf16 %v1418_v19  ;;  %v1511_v19 = vld [vmem:[%s1737_s1] sm:$0xff]  }
  0x79   :  { %v73_v24 = vsel %vm71_vm0, %v1122_v23, %v1123_v22  ;;  %v120_v31 = vsel %vm118_vm1, %v1132_v21, %v1133_v20 }
  0x7a   :  { %v1427_v25 = vpop.permute.xlu1 %1135  ;;  %v1429_v26 = vpop.permute.xlu0 %1125  ;;  %v474_v27 = vpack.c.bf16 %v73_v24, %v1329_v0 }
  0x7b   :  { %v1138_v28 = vunpack.i.h.bf16 %v1427_v25  ;;  %v1137_v29 = vunpack.i.l.bf16 %v1427_v25  ;;  %v1127_v30 = vunpack.i.l.bf16 %v1429_v26  ;;  %v1128_v17 = vunpack.i.h.bf16 %v1429_v26 }
  0x7c   :  { %567 = vmatprep.subr.bf16.mxu0 %v474_v27 }
  0x7d   :  { %v72_v32 = vsel %vm71_vm0, %v1127_v30, %v1122_v23  ;;  %v167_v33 = vsel %vm165_vm2, %v1137_v29, %v1138_v28 }
  0x7e   :  { %v1442_v34 = vpop.permute.xlu1 %1145  ;;  %v1444_v35 = vpop.permute.xlu0 %1140  ;;  %v473_v36 = vpack.c.bf16 %v72_v32, %v1339_v2  ;;  %v480_v37 = vpack.c.bf16 %v167_v33, %v120_v31 }
  0x7f   :  { %v1147_v38 = vunpack.i.l.bf16 %v1442_v34  ;;  %v1142_v39 = vunpack.i.l.bf16 %v1444_v35  ;;  %v1148_v26 = vunpack.i.h.bf16 %v1442_v34 }
  0x80   :  { %568 = vmatpush1.bf16.msra.mxu0 %v473_v36 }
  0x81   :  { %569 = vmatprep.subr.bf16.mxu0 %v480_v37  ;;  %v119_v40 = vsel %vm118_vm1, %v1142_v39, %v1132_v21  ;;  %v166_v41 = vsel %vm165_vm2, %v1147_v38, %v1137_v29  ;;  %v74_v37 = vsel %vm71_vm0, %v1123_v22, %v1128_v17  ;;  %v1143_v39 = vunpack.i.h.bf16 %v1444_v35 }
  0x82   :  { %v1451_v42 = vpop.permute.xlu1 %1155  ;;  %v1453_v43 = vpop.permute.xlu0 %1150  ;;  %v479_v44 = vpack.c.bf16 %v166_v41, %v119_v40 }
  0x83   :  { %v1158_v45 = vunpack.i.h.bf16 %v1451_v42  ;;  %v1157_v46 = vunpack.i.l.bf16 %v1451_v42  ;;  %v1153_v47 = vunpack.i.h.bf16 %v1453_v43  ;;  %v1152_v48 = vunpack.i.l.bf16 %v1453_v43 }
  0x84   :  { %570 = vmatpush1.bf16.msra.mxu0 %v479_v44 }
  0x85   :  { %v214_v49 = vsel %vm212_vm3, %v1152_v48, %v1153_v47  ;;  %v261_v50 = vsel %vm259_vm4, %v1157_v46, %v1158_v45 }
  0x86   :  { %v1465_v51 = vpop.permute.xlu1 %1165  ;;  %v1467_v52 = vpop.permute.xlu0 %1160  ;;  %v486_v53 = vpack.c.bf16 %v261_v50, %v214_v49  ;;  %v475_v49 = vpack.c.bf16 %v74_v37, %v1334_v1  ;;  %v168_v1 = vsel %vm165_vm2, %v1138_v28, %v1148_v26 }
  0x87   :  { %v1167_v54 = vunpack.i.l.bf16 %v1465_v51  ;;  %v1162_v55 = vunpack.i.l.bf16 %v1467_v52  ;;  %v1168_v25 = vunpack.i.h.bf16 %v1465_v51  ;;  %v1163_v28 = vunpack.i.h.bf16 %v1467_v52 }
  0x88   :  { %571 = vmatprep.subr.bf16.mxu0 %v486_v53 }
  0x89   :  { %v213_v56 = vsel %vm212_vm3, %v1162_v55, %v1152_v48  ;;  %v260_v57 = vsel %vm259_vm4, %v1167_v54, %v1157_v46  ;;  %v215_v51 = vsel %vm212_vm3, %v1153_v47, %v1163_v28  ;;  %v262_v52 = vsel %vm259_vm4, %v1158_v45, %v1168_v25 }
  0x8a   :  { %v1473_v58 = vpop.permute.xlu1 %1175  ;;  %v1475_v59 = vpop.permute.xlu0 %1170  ;;  %v485_v60 = vpack.c.bf16 %v260_v57, %v213_v56  ;;  %v487_v47 = vpack.c.bf16 %v262_v52, %v215_v51 }
  0x8b   :  { %v1178_v61 = vunpack.i.h.bf16 %v1473_v58  ;;  %v1177_v62 = vunpack.i.l.bf16 %v1473_v58  ;;  %v1173_v63 = vunpack.i.h.bf16 %v1475_v59  ;;  %v1172_v0 = vunpack.i.l.bf16 %v1475_v59 }
  0x8c   :  { %572 = vmatpush1.bf16.msra.mxu0 %v485_v60 }
  0x8d   :  { %v308_v2 = vsel %vm306_vm6, %v1172_v0, %v1173_v63  ;;  %v355_v3 = vsel %vm353_vm5, %v1177_v62, %v1178_v61 }
  0x8e   :  { %v340_v5 = vpop.permute.xlu1 %339  ;;  %v1487_v6 = vpop.permute.xlu0 %1180  ;;  %v492_v10 = vpack.c.bf16 %v355_v3, %v308_v2 }
  0x8f   :  { %v354_v11 = vsel %vm353_vm5, %v340_v5, %v1177_v62  ;;  %v1182_v12 = vunpack.i.l.bf16 %v1487_v6 }
  0x90   :  { %573 = vmatprep.subr.bf16.mxu0 %v492_v10  ;;  %v1537_v10 = vld [vmem:[%s1737_s1 + $0x8] sm:$0xff]  }
  0x91   :  { %v307_v13 = vsel %vm306_vm6, %v1182_v12, %v1172_v0 }
  0x92   :  { %v1492_v14 = vpop.permute.xlu1 %390  ;;  %v1186_v15 = vpop.permute.xlu0 %1185  ;;  %v491_v16 = vpack.c.bf16 %v354_v11, %v307_v13 }
  0x93   :  { %v1188_v21 = vunpack.i.h.bf16 %v1186_v15  ;;  %v1187_v23 = vunpack.i.l.bf16 %v1186_v15 }
  0x94   :  { %574 = vmatpush1.bf16.msra.mxu0 %v491_v16 }
  0x95   :  { %v402_v24 = vsel %vm400_vm7, %v1188_v21, %v1492_v14  ;;  %v401_v27 = vsel %vm400_vm7, %v1187_v23, %v1188_v21 }
  0x96   :  { %v498_v29 = vpack.c.bf16 %v402_v24, %v402_v24  ;;  %v70_v30 = vpop.permute.xlu1 %69  ;;  %v1191_v31 = vpop.permute.xlu0 %1190  ;;  %v497_v32 = vpack.c.bf16 %v401_v27, %v401_v27 }
  0x97   :  { %v1193_v33 = vunpack.i.h.bf16 %v1191_v31  ;;  %v1192_v36 = vunpack.i.l.bf16 %v1191_v31  ;;  %v1183_v31 = vunpack.i.h.bf16 %v1487_v6 }
  0x98   :  { %1072 = vmatprep.subr.msk.bf16.mxu0 %vm548_vm8, %v498_v29  ;;  %v550_v38 = vsel %vm548_vm8, %v497_v32, 0 }
  0x99   :  { %v76_v40 = vsel %vm71_vm0, %v1192_v36, %v1193_v33  ;;  %576 = vmatpush1.bf16.msra.mxu0 %v550_v38  ;;  %v75_v41 = vsel %vm71_vm0, %v1128_v17, %v1192_v36  ;;  %v77_v44 = vsel %vm71_vm0, %v1193_v33, %v70_v30 }
  0x9a   :  { %v477_v22 = vpack.c.bf16 %v76_v40, %v1370_v7  ;;  %v1201_v34 = vpop.permute.xlu1 %1200  ;;  %v1196_v46 = vpop.permute.xlu0 %1195  ;;  %v476_v48 = vpack.c.bf16 %v75_v41, %v1346_v4  ;;  %v478_v35 = vpack.c.bf16 %v77_v44, %v1375_v8  ;;  %v121_v4 = vsel %vm118_vm1, %v1133_v20, %v1143_v39 }
  0x9b   :  { %v1203_v50 = vunpack.i.h.bf16 %v1201_v34  ;;  %v1202_v53 = vunpack.i.l.bf16 %v1201_v34  ;;  %v1198_v54 = vunpack.i.h.bf16 %v1196_v46  ;;  %v1197_v55 = vunpack.i.l.bf16 %v1196_v46 }
  0x9c   :  { %620 = vmatprep.subr.bf16.mxu1 %v476_v48  ;;  %673 = vmatprep.subr.bf16.mxu0 %v478_v35  ;;  %v481_v3 = vpack.c.bf16 %v168_v1, %v121_v4  ;;  %v309_v40 = vsel %vm306_vm6, %v1173_v63, %v1183_v31 }
  0x9d   :  { %1073 = vmatmul.mubr.msk.bf16.vlgmr.msra.gmra.mrb[0].mxu0 %vm541_vm9, %v1511_v19  ;;  %621 = vmatpush1.bf16.msra.mxu1 %v475_v49  ;;  %v122_v7 = vsel %vm118_vm1, %v1143_v39, %v1197_v55  ;;  %v170_v8 = vsel %vm165_vm2, %v1202_v53, %v1203_v50  ;;  %v123_v56 = vsel %vm118_vm1, %v1197_v55, %v1198_v54 }
  0x9e   :  { %674 = vmatpush1.bf16.msra.mxu0 %v477_v22  ;;  %v164_v57 = vpop.permute.xlu1 %163  ;;  %v117_v60 = vpop.permute.xlu0 %116  ;;  %v169_v62 = vsel %vm165_vm2, %v1148_v26, %v1202_v53  ;;  %609 = vmatprep.mubr.bf16.mxu0 %v1278_v9  ;;  %v483_v5 = vpack.c.bf16 %v170_v8, %v123_v56 }
  0x9f   :  { %v171_v0 = vsel %vm165_vm2, %v1203_v50, %v164_v57  ;;  %v124_v18 = vsel %vm118_vm1, %v1198_v54, %v117_v60  ;;  %v482_v20 = vpack.c.bf16 %v169_v62, %v122_v7 }
  0xa0   :  { %v484_v2 = vpack.c.bf16 %v171_v0, %v124_v18 }
  0xa1   :  { %622 = vmatprep.subr.bf16.mxu1 %v482_v20 }
  0xa2   :  { %623 = vmatpush1.bf16.msra.mxu1 %v481_v3  ;;  %v1211_v11 = vpop.permute.xlu1 %1210  ;;  %v1206_v12 = vpop.permute.xlu0 %1205  ;;  %675 = vmatprep.subr.bf16.mxu0 %v484_v2 }
  0xa3   :  { %v1213_v13 = vunpack.i.h.bf16 %v1211_v11  ;;  %v1212_v15 = vunpack.i.l.bf16 %v1211_v11  ;;  %v1208_v16 = vunpack.i.h.bf16 %v1206_v12  ;;  %v1207_v17 = vunpack.i.l.bf16 %v1206_v12  ;;  %676 = vmatpush1.bf16.msra.mxu0 %v483_v5 }
  0xa5   :  { %v216_v21 = vsel %vm212_vm3, %v1163_v28, %v1207_v17  ;;  %v263_v23 = vsel %vm259_vm4, %v1168_v25, %v1212_v15  ;;  %1074 = vmatmul.mubr.msk.bf16.gmra.mrb[4].mxu0 %vm541_vm9, %v1537_v10  ;;  %v264_v24 = vsel %vm259_vm4, %v1212_v15, %v1213_v13  ;;  %v217_v27 = vsel %vm212_vm3, %v1207_v17, %v1208_v16 }
  0xa6   :  { %v258_v29 = vpop.permute.xlu1 %257  ;;  %v211_v30 = vpop.permute.xlu0 %210  ;;  %v488_v43 = vpack.c.bf16 %v263_v23, %v216_v21  ;;  %705 = vmatprep.mubr.bf16.mxu0 %v1278_v9  ;;  %v489_v33 = vpack.c.bf16 %v264_v24, %v217_v27 }
  0xa7   :  { %v265_v42 = vsel %vm259_vm4, %v1213_v13, %v258_v29  ;;  %v218_v45 = vsel %vm212_vm3, %v1208_v16, %v211_v30 }
  0xa8   :  { %v490_v32 = vpack.c.bf16 %v265_v42, %v218_v45  ;;  %624 = vmatprep.subr.bf16.mxu1 %v488_v43 }
  0xa9   :  { %625 = vmatpush1.bf16.msra.mxu1 %v487_v47 }
  0xaa   :  { %v1221_v36 = vpop.permute.xlu1 %1220  ;;  %v1216_v37 = vpop.permute.xlu0 %1215  ;;  %677 = vmatprep.subr.bf16.mxu0 %v490_v32 }
  0xab   :  { %v1223_v26 = vunpack.i.h.bf16 %v1221_v36  ;;  %v1222_v38 = vunpack.i.l.bf16 %v1221_v36  ;;  %v1217_v39 = vunpack.i.l.bf16 %v1216_v37  ;;  %678 = vmatpush1.bf16.msra.mxu0 %v489_v33  ;;  %v1218_v41 = vunpack.i.h.bf16 %v1216_v37 }
  0xad   :  { %v310_v44 = vsel %vm306_vm6, %v1183_v31, %v1217_v39  ;;  %v357_v6 = vsel %vm353_vm5, %v1222_v38, %v1223_v26  ;;  %v356_v22 = vsel %vm353_vm5, %v1178_v61, %v1222_v38  ;;  %v311_v59 = vsel %vm306_vm6, %v1217_v39, %v1218_v41 }
  0xae   :  { %v1226_v34 = vpop.permute.xlu1 %1225  ;;  %v305_v46 = vpop.permute.xlu0 %304  ;;  %v494_v48 = vpack.c.bf16 %v357_v6, %v310_v44  ;;  %v493_v35 = vpack.c.bf16 %v356_v22, %v309_v40 }
  0xaf   :  { %v1228_v49 = vunpack.i.h.bf16 %v1226_v34  ;;  %v1227_v50 = vunpack.i.l.bf16 %v1226_v34  ;;  %v312_v54 = vsel %vm306_vm6, %v1218_v41, %v305_v46 }
  0xb0   :  { %626 = vmatprep.subr.bf16.mxu1 %v494_v48 }
  0xb1   :  { %v358_v63 = vsel %vm353_vm5, %v1223_v26, %v1227_v50  ;;  %v359_v53 = vsel %vm353_vm5, %v1227_v50, %v1228_v49  ;;  %627 = vmatpush1.bf16.msra.mxu1 %v493_v35 }
  0xb2   :  { %v495_v55 = vpack.c.bf16 %v358_v63, %v311_v59  ;;  %v496_v58 = vpack.c.bf16 %v359_v53, %v312_v54  ;;  %v1236_v7 = vpop.permute.xlu1 %1235  ;;  %v1231_v61 = vpop.permute.xlu0 %1230 }
  0xb3   :  { %v1238_v4 = vunpack.i.h.bf16 %v1236_v7  ;;  %v1237_v1 = vunpack.i.l.bf16 %v1236_v7  ;;  %v1233_v8 = vunpack.i.h.bf16 %v1231_v61  ;;  %v1232_v56 = vunpack.i.l.bf16 %v1231_v61 }
  0xb4   :  { %679 = vmatprep.subr.bf16.mxu0 %v496_v58 }
  0xb5   :  { %v406_v57 = vsel %vm400_vm7, %v1237_v1, %v1238_v4  ;;  %v404_v60 = vsel %vm400_vm7, %v1232_v56, %v1233_v8  ;;  %680 = vmatpush1.bf16.msra.mxu0 %v495_v55  ;;  %v403_v62 = vsel %vm400_vm7, %v1492_v14, %v1232_v56  ;;  %v405_v0 = vsel %vm400_vm7, %v1233_v8, %v1237_v1 }
  0xb6   :  { %v502_v18 = vpack.c.bf16 %v406_v57, %v406_v57  ;;  %v500_v20 = vpack.c.bf16 %v404_v60, %v404_v60  ;;  %v499_v25 = vpack.c.bf16 %v403_v62, %v403_v62  ;;  %v501_v28 = vpack.c.bf16 %v405_v0, %v405_v0 }
  0xb7   :  { %v752_v14 = vlaneseq }
  0xb8   :  { %1075 = vmatprep.subr.msk.bf16.mxu1 %vm548_vm8, %v500_v20  ;;  %1078 = vmatprep.subr.msk.bf16.mxu0 %vm548_vm8, %v502_v18  ;;  %v556_v2 = vsel %vm548_vm8, %v499_v25, 0  ;;  %v562_v3 = vsel %vm548_vm8, %v501_v28, 0 }
  0xb9   :  { %629 = vmatpush1.bf16.msra.mxu1 %v556_v2  ;;  %682 = vmatpush1.bf16.msra.mxu0 %v562_v3  ;;  %v1586_v5 = vshrl.u32 %v752_v14, 7 }
  0xbb   :  { %v754_v11 = vsub.s32 0, %v1586_v5  ;;  %v758_v13 = vsub.s32 1, %v1586_v5  ;;  %v762_v58 = vsub.s32 2, %v1586_v5  ;;  %v770_v7 = vsub.s32 4, %v1586_v5 }
  0xbc   :  { %1076 = vmatmul.mubr.msk.bf16.vlgmr.msra.gmra.mrb[0].mxu1 %vm541_vm9, %v1511_v19  ;;  %1079 = vmatmul.mubr.msk.bf16.vlgmr.msra.gmra.mrb[8].mxu0 %vm541_vm9, %v1511_v19  ;;  %v750_v19 = vld [vmem:[%s1739_s3] sm:$0x3f]  ;;  %v766_v61 = vsub.s32 3, %v1586_v5  ;;  %v774_v4 = vsub.s32 5, %v1586_v5 }
  0xbd   :  { %662 = vmatprep.mubr.bf16.mxu1 %v1278_v9  ;;  %715 = vmatprep.mubr.bf16.mxu0 %v1278_v9  ;;  %v755_v51 = vrot.slane %v750_v19, %v754_v11  ;;  %v1615_v57 = vrot.slane %v750_v19, %v762_v58  ;;  %v1617_v0 = vrot.slane %v750_v19, %v770_v7 }
  0xbe   :  { %v1619_v25 = vrot.slane %v750_v19, %v766_v61  ;;  %v1621_v3 = vrot.slane %v750_v19, %v774_v4 }
  0xc3   :  { %v514_v12 = vpop.permute.xlu0 %513  ;;  %v1593_v9 = vpop.permute.xlu1 %518 }
  0xc4   :  { %1077 = vmatmul.mubr.msk.bf16.gmra.mrb[4].mxu1 %vm541_vm9, %v1537_v10  ;;  %1080 = vmatmul.mubr.msk.bf16.gmra.mrb[12].mxu0 %vm541_vm9, %v1537_v10  ;;  %v759_v10 = vrot.slane %v750_v19, %v758_v13 }
  0xc7   :  { %v1597_v47 = vpop.permute.xlu1 %523  ;;  %v1599_v37 = vpop.permute.xlu0 %528 }
 0x170   :  { %v601_v15 = vpop.f32.mrb[0].mxu0 }
 0x171   :  { %v603_v16 = vpop.f32.mrb[1].mxu0  ;;  %v602_v17 = vadd.f32 %v601_v15, %v514_v12 }
 0x172   :  { %v605_v52 = vpop.f32.mrb[2].mxu0  ;;  %v604_v21 = vadd.f32 %v603_v16, %v514_v12 }
 0x173   :  { %v607_v23 = vpop.f32.mrb[3].mxu0  ;;  %v726_v24 = vmax.f32 %v602_v17, 0.0  ;;  %v606_v27 = vadd.f32 %v605_v52, %v1593_v9 }
 0x174   :  { %v608_v29 = vadd.f32 %v607_v23, %v1593_v9  ;;  %v727_v30 = vmax.f32 %v604_v21, 0.0 }
 0x175   :  { %v782_v43 = vmul.f32 %v755_v51, %v726_v24  ;;  %v732_v42 = vmax.f32 %v606_v27, 0.0 }
 0x176   :  { %v733_v45 = vmax.f32 %v608_v29, 0.0  ;;  %v783_v31 = vmul.f32 %v759_v10, %v727_v30 }
 0x177   :  { %v788_v32 = vmul.f32 %v755_v51, %v732_v42 }
 0x178   :  { %v789_v33 = vmul.f32 %v759_v10, %v733_v45  ;;  %v611_v36 = vpop.f32.mrb[4].mxu0  ;;  %v806_v26 = vadd.f32 %v783_v31, %v782_v43 }
 0x179   :  { %v613_v38 = vpop.f32.mrb[5].mxu0  ;;  %v612_v39 = vadd.f32 %v611_v36, %v1597_v47 }
 0x17a   :  { %v615_v40 = vpop.f32.mrb[6].mxu0  ;;  %v1602_v41 = vadd.f32 %v789_v33, %v788_v32  ;;  %v614_v44 = vadd.f32 %v613_v38, %v1597_v47 }
 0x17b   :  { %v617_v6 = vpop.f32.mrb[7].mxu0  ;;  %v738_v22 = vmax.f32 %v612_v39, 0.0  ;;  %v616_v34 = vadd.f32 %v615_v40, %v1599_v37 }
 0x17c   :  { %v739_v46 = vmax.f32 %v614_v44, 0.0  ;;  %v618_v48 = vadd.f32 %v617_v6, %v1599_v37 }
 0x17d   :  { %v794_v35 = vmul.f32 %v755_v51, %v738_v22  ;;  %v744_v49 = vmax.f32 %v616_v34, 0.0 }
 0x17e   :  { %v795_v50 = vmul.f32 %v759_v10, %v739_v46  ;;  %v745_v59 = vmax.f32 %v618_v48, 0.0 }
 0x17f   :  { %v800_v63 = vmul.f32 %v755_v51, %v744_v49 }
 0x180   :  { %v1607_v53 = vadd.f32 %v795_v50, %v794_v35  ;;  %v801_v54 = vmul.f32 %v759_v10, %v745_v59 }
 0x182   :  { %v1609_v55 = vadd.f32 %v801_v54, %v800_v63 }
 0x18f   :  { %v654_v1 = vpop.f32.mrb[0].mxu1  ;;  %v707_v8 = vpop.f32.mrb[8].mxu0 }
 0x190   :  { %v655_v56 = vadd.f32 %v654_v1, %v514_v12  ;;  %v656_v60 = vpop.f32.mrb[1].mxu1  ;;  %v708_v62 = vadd.f32 %v707_v8, %v514_v12  ;;  %v709_v18 = vpop.f32.mrb[9].mxu0 }
 0x191   :  { %v657_v20 = vadd.f32 %v656_v60, %v514_v12  ;;  %v658_v28 = vpop.f32.mrb[2].mxu1  ;;  %v710_v2 = vadd.f32 %v709_v18, %v514_v12  ;;  %v711_v14 = vpop.f32.mrb[10].mxu0 }
 0x192   :  { %v728_v11 = vmax.f32 %v655_v56, 0.0  ;;  %v730_v5 = vmax.f32 %v708_v62, 0.0  ;;  %v659_v13 = vadd.f32 %v658_v28, %v1593_v9  ;;  %v660_v15 = vpop.f32.mrb[3].mxu1  ;;  %v712_v16 = vadd.f32 %v711_v14, %v1593_v9  ;;  %v713_v17 = vpop.f32.mrb[11].mxu0 }
 0x193   :  { %v729_v51 = vmax.f32 %v657_v20, 0.0  ;;  %v731_v52 = vmax.f32 %v710_v2, 0.0  ;;  %v661_v10 = vadd.f32 %v660_v15, %v1593_v9  ;;  %v714_v21 = vadd.f32 %v713_v17, %v1593_v9 }
 0x194   :  { %v784_v23 = vmul.f32 %v1615_v57, %v728_v11  ;;  %v786_v12 = vmul.f32 %v1617_v0, %v730_v5  ;;  %v734_v19 = vmax.f32 %v659_v13, 0.0  ;;  %v736_v24 = vmax.f32 %v712_v16, 0.0 }
 0x195   :  { %v785_v27 = vmul.f32 %v1619_v25, %v729_v51  ;;  %v787_v29 = vmul.f32 %v1621_v3, %v731_v52  ;;  %v735_v30 = vmax.f32 %v661_v10, 0.0  ;;  %v737_v43 = vmax.f32 %v714_v21, 0.0  ;;  %v1243_v10 = vld [vmem:[%s1740_s4] sm:$0xff]   ;;  %v868_v21 = vld [vmem:[%s1741_s5 + $0x30] sm:$0xff] }
 0x196   :  { %v790_v42 = vmul.f32 %v1615_v57, %v734_v19  ;;  %v792_v45 = vmul.f32 %v1617_v0, %v736_v24  ;;  %v807_v31 = vadd.f32 %v806_v26, %v784_v23  ;;  %1099 = vmatprep.mubr.msk.bf16.mxu1 %vm930_vm10, %v1243_v10  ;;  %v869_v23 = vld [vmem:[%s1741_s5 + $0x38] sm:$0xff] }
 0x197   :  { %v791_v32 = vmul.f32 %v1619_v25, %v735_v30  ;;  %v664_v9 = vpop.f32.mrb[4].mxu1  ;;  %v717_v33 = vpop.f32.mrb[12].mxu0  ;;  %v827_v36 = vadd.f32 %v786_v12, %v785_v27  ;;  %v793_v38 = vmul.f32 %v1621_v3, %v737_v43 }
 0x198   :  { %v665_v39 = vadd.f32 %v664_v9, %v1597_v47  ;;  %v718_v40 = vadd.f32 %v717_v33, %v1597_v47  ;;  %v666_v44 = vpop.f32.mrb[5].mxu1  ;;  %v719_v6 = vpop.f32.mrb[13].mxu0  ;;  %808 = vadd.xlane.f32.xlu1 %v807_v31  ;;  %v811_v22 = vadd.f32 %v1602_v41, %v790_v42 }
 0x199   :  { %v667_v34 = vadd.f32 %v666_v44, %v1597_v47  ;;  %v720_v26 = vadd.f32 %v719_v6, %v1597_v47  ;;  %v668_v46 = vpop.f32.mrb[6].mxu1  ;;  %v721_v48 = vpop.f32.mrb[14].mxu0  ;;  %v828_v35 = vadd.f32 %v827_v36, %v787_v29  ;;  %v831_v49 = vadd.f32 %v792_v45, %v791_v32 }
 0x19a   :  { %v740_v50 = vmax.f32 %v665_v39, 0.0  ;;  %v742_v59 = vmax.f32 %v718_v40, 0.0  ;;  %v669_v63 = vadd.f32 %v668_v46, %v1599_v37  ;;  %v722_v54 = vadd.f32 %v721_v48, %v1599_v37  ;;  %v670_v58 = vpop.f32.mrb[7].mxu1  ;;  %v723_v7 = vpop.f32.mrb[15].mxu0  ;;  %812 = vadd.xlane.f32.xlu0 %v811_v22  ;;  %v1245_v39 = vld [vmem:[%s1740_s4 + $0x10] sm:$0xff]   ;;  %v1246_v40 = vld [vmem:[%s1740_s4 + $0x18] sm:$0xff]  }
 0x19b   :  { %v741_v61 = vmax.f32 %v667_v34, 0.0  ;;  %v743_v4 = vmax.f32 %v720_v26, 0.0  ;;  %v671_v41 = vadd.f32 %v670_v58, %v1599_v37  ;;  %v724_v1 = vadd.f32 %v723_v7, %v1599_v37  ;;  %v1010_v46 = vld [vmem:[%s1742_s6 + $0x10] sm:$0xff] }
 0x19c   :  { %v796_v47 = vmul.f32 %v1615_v57, %v740_v50  ;;  %v798_v8 = vmul.f32 %v1617_v0, %v742_v59  ;;  %v746_v56 = vmax.f32 %v669_v63, 0.0  ;;  %v748_v60 = vmax.f32 %v722_v54, 0.0  ;;  %v1011_v63 = vld [vmem:[%s1742_s6 + $0x18] sm:$0xff] }
 0x19d   :  { %v797_v62 = vmul.f32 %v1619_v25, %v741_v61  ;;  %v747_v18 = vmax.f32 %v671_v41, 0.0  ;;  %v749_v20 = vmax.f32 %v724_v1, 0.0  ;;  %v832_v11 = vadd.f32 %v831_v49, %v793_v38  ;;  %v1244_v38 = vld [vmem:[%s1740_s4 + $0x8] sm:$0xff]   ;;  %v1008_v49 = vld [vmem:[%s1742_s6] sm:$0xff] }
 0x19e   :  { %v802_v28 = vmul.f32 %v1615_v57, %v746_v56  ;;  %v804_v2 = vmul.f32 %v1617_v0, %v748_v60  ;;  %v815_v14 = vadd.f32 %v1607_v53, %v796_v47  ;;  %v799_v5 = vmul.f32 %v1621_v3, %v743_v4  ;;  %v863_v53 = vld [vmem:[%s1741_s5 + $0x8] sm:$0xff]  ;;  %v862_v57 = vld [vmem:[%s1741_s5] sm:$0xff]  ;;  %v865_v0 = vld [vmem:[%s1741_s5 + $0x18] sm:$0xff] }
 0x19f   :  { %v803_v37 = vmul.f32 %v1619_v25, %v747_v18  ;;  %v835_v13 = vadd.f32 %v798_v8, %v797_v62  ;;  %v805_v16 = vmul.f32 %v1621_v3, %v749_v20  ;;  %v866_v25 = vld [vmem:[%s1741_s5 + $0x20] sm:$0xff]  ;;  %v867_v3 = vld [vmem:[%s1741_s5 + $0x28] sm:$0xff] }
 0x1a0   :  { %816 = vadd.xlane.f32.xlu0 %v815_v14  ;;  %v819_v15 = vadd.f32 %v1609_v55, %v802_v28  ;;  %v864_v55 = vld [vmem:[%s1741_s5 + $0x10] sm:$0xff]  ;;  %v1009_v4 = vld [vmem:[%s1742_s6 + $0x8] sm:$0xff] }
 0x1a1   :  { %v836_v17 = vadd.f32 %v835_v13, %v799_v5  ;;  %v839_v51 = vadd.f32 %v804_v2, %v803_v37  ;;  %v1012_v2 = vld [vmem:[%s1742_s6 + $0x20] sm:$0xff]  ;;  %v1014_v13 = vld [vmem:[%s1742_s6 + $0x30] sm:$0xff] }
 0x1a2   :  { %820 = vadd.xlane.f32.xlu1 %v819_v15 }
 0x1a3   :  { %v840_v52 = vadd.f32 %v839_v51, %v805_v16  ;;  %v1013_v16 = vld [vmem:[%s1742_s6 + $0x28] sm:$0xff] }
 0x1a4   :  { %829 = vadd.xlane.f32.xlu0 %v828_v35 }
 0x1a6   :  { %833 = vadd.xlane.f32.xlu1 %v832_v11 }
 0x1a8   :  { %837 = vadd.xlane.f32.xlu0 %v836_v17 }
 0x1aa   :  { %841 = vadd.xlane.f32.xlu1 %v840_v52 }
 0x1bb   :  { %877 = vperm.xlu1 %1240, %v863_v53   ;;  %v1015_v53 = vld [vmem:[%s1742_s6 + $0x38] sm:$0xff]  ;;  %s1280_s6 = smov [#allocation4]  }
 0x1be   :  { %872 = vperm.xlu0 %1239, %v862_v57  }
 0x1bf   :  { %882 = vperm.xlu1 %1240, %v864_v55  }
 0x1c2   :  { %887 = vperm.xlu0 %1239, %v865_v0  }
 0x1c3   :  { %892 = vperm.xlu1 %1240, %v866_v25   ;;  %v1032_v25 = vld [vmem:[%s1743_s7] sm:$0xff] }
 0x1c6   :  { %897 = vperm.xlu0 %1239, %v867_v3  }
 0x1c7   :  { %902 = vperm.xlu1 %1240, %v868_v21  }
 0x1ca   :  { %907 = vperm.xlu0 %1239, %v869_v23   ;;  %v1033_v23 = vld [vmem:[%s1743_s7 + $0x8] sm:$0xff]  ;;  %s1062_s7 = sshll.u32 %s1280_s6, 4  ;;  %s1063_s7 = int_to_ptr.vmem [resolvable:$true] %s1062_s7 }
 0x1cb   :  { %s1247_s9 = scalar_lea.vmem %s1063_s7, 16  ;;  %s1251_s5 = scalar_lea.vmem %s1063_s7, 32 }
 0x1cc   :  { %p1248_p0 = scmp.ne.s32.totalorder %s1063_s7, %s1247_s9  ;;  %p1252_p1 = scmp.lt.s32.totalorder %s1063_s7, %s1063_s7 }
 0x1cd   :  { %p1253_p2 = scmp.lt.s32.totalorder %s1251_s5, %s1247_s9 }
 0x1cf   :  { %p1254_p3 = por %p1253_p2, %p1252_p1 }
 0x1d1   :  { %p1255_p4 = pnand %p1254_p3, %p1248_p0 }
 0x225   :  { %v809_v12 = vpop.xlane.xlu1 %808 }
 0x226   :  { %823 = vst.msk [vmem:[#allocation3] sm:$0xff] %vm822_vm11, %v809_v12 }
 0x227   :  { %v813_v19 = vpop.xlane.xlu0 %812 }
 0x228   :  { %824 = vst.msk [vmem:[#allocation3 + $0x8] sm:$0xff] %vm822_vm11, %v813_v19 }
 0x22d   :  { %v817_v24 = vpop.xlane.xlu0 %816 }
 0x22e   :  { %825 = vst.msk [vmem:[#allocation3 + $0x10] sm:$0xff] %vm822_vm11, %v817_v24 }
 0x22f   :  { %v821_v27 = vpop.xlane.xlu1 %820 }
 0x230   :  { %826 = vst.msk [vmem:[#allocation3 + $0x18] sm:$0xff] %vm822_vm11, %v821_v27 }
 0x231   :  { %v830_v29 = vpop.xlane.xlu0 %829 }
 0x232   :  { %844 = vst.msk [vmem:[#allocation3] sm:$0xff] %vm843_vm12, %v830_v29 }
 0x233   :  { %v834_v30 = vpop.xlane.xlu1 %833 }
 0x234   :  { %845 = vst.msk [vmem:[#allocation3 + $0x8] sm:$0xff] %vm843_vm12, %v834_v30 }
 0x235   :  { %v838_v43 = vpop.xlane.xlu0 %837 }
 0x236   :  { %846 = vst.msk [vmem:[#allocation3 + $0x10] sm:$0xff] %vm843_vm12, %v838_v43 }
 0x237   :  { %v842_v42 = vpop.xlane.xlu1 %841 }
 0x238   :  { %847 = vst.msk [vmem:[#allocation3 + $0x18] sm:$0xff] %vm843_vm12, %v842_v42 }
 0x239   :  { %v856_v45 = vld [vmem:[#allocation3] sm:$0xff] }
 0x23b   :  { %v857_v31 = vld [vmem:[#allocation3 + $0x8] sm:$0xff]  ;;  %v878_v44 = vpop.permute.xlu1 %877 }
 0x23c   :  { %v860_v32 = vpack.c.bf16 %v857_v31, %v856_v45 }
 0x23d   :  { %v858_v9 = vld [vmem:[#allocation3 + $0x10] sm:$0xff]  ;;  %v873_v6 = vpop.permute.xlu0 %872 }
 0x23e   :  { %1095 = vmatprep.subr.bf16.mxu1 %v860_v32 }
 0x23f   :  { %1096 = vmatpush3.bf16.msra.mxu1 %v860_v32  ;;  %v859_v33 = vld [vmem:[#allocation3 + $0x18] sm:$0xff]  ;;  %v883_v22 = vpop.permute.xlu1 %882 }
 0x240   :  { %v861_v36 = vpack.c.bf16 %v859_v33, %v858_v9 }
 0x241   :  { %v888_v34 = vpop.permute.xlu0 %887 }
 0x242   :  { %1097 = vmatprep.subr.bf16.mxu1 %v861_v36 }
 0x243   :  { %1098 = vmatpush3.bf16.msra.mxu1 %v861_v36  ;;  %v893_v54 = vpop.permute.xlu1 %892 }
 0x245   :  { %v898_v47 = vpop.permute.xlu0 %897 }
 0x246   :  { %1100 = vmatmul.mubr.msk.bf16.vlgmr.msra.gmra.mrb[8].mxu1 %vm930_vm10, %v1244_v38 }
 0x247   :  { %1103 = vmatprep.mubr.msk.bf16.mxu1 %vm930_vm10, %v1245_v39  ;;  %v903_v20 = vpop.permute.xlu1 %902 }
 0x249   :  { %v908_v37 = vpop.permute.xlu0 %907 }
 0x24e   :  { %1104 = vmatmul.mubr.msk.bf16.gmra.mrb[12].mxu1 %vm930_vm10, %v1246_v40 }
 0x319   :  { %v1101_v26 = vpop.f32.mrb[8].mxu1 }
 0x31a   :  { %v986_v48 = vadd.f32 %v1101_v26, %v883_v22  ;;  %v977_v35 = vpop.f32.mrb[9].mxu1 }
 0x31b   :  { %v978_v50 = vadd.f32 %v977_v35, %v873_v6  ;;  %v1102_v59 = vpop.f32.mrb[10].mxu1 }
 0x31c   :  { %v1018_v58 = vmul.f32 %v1010_v46, %v986_v48  ;;  %v989_v7 = vadd.f32 %v1102_v59, %v888_v34  ;;  %v980_v61 = vpop.f32.mrb[11].mxu1 }
 0x31d   :  { %v1016_v41 = vmul.f32 %v1008_v49, %v978_v50  ;;  %v981_v1 = vadd.f32 %v980_v61, %v878_v44 }
 0x31e   :  { %v1019_v8 = vmul.f32 %v1011_v63, %v989_v7 }
 0x31f   :  { %v1026_v56 = vadd.f32 %v1018_v58, %v1016_v41  ;;  %v1017_v60 = vmul.f32 %v1009_v4, %v981_v1 }
 0x321   :  { %v1027_v62 = vadd.f32 %v1019_v8, %v1017_v60  ;;  %v1105_v18 = vpop.f32.mrb[12].mxu1 }
 0x322   :  { %v993_v28 = vpop.f32.mrb[13].mxu1  ;;  %v1002_v14 = vadd.f32 %v1105_v18, %v903_v20 }
 0x323   :  { %v994_v11 = vadd.f32 %v993_v28, %v893_v54  ;;  %v1106_v5 = vpop.f32.mrb[14].mxu1 }
 0x324   :  { %v996_v15 = vpop.f32.mrb[15].mxu1  ;;  %v1005_v51 = vadd.f32 %v1106_v5, %v908_v37  ;;  %v1022_v57 = vmul.f32 %v1014_v13, %v1002_v14 }
 0x325   :  { %v1020_v17 = vmul.f32 %v1012_v2, %v994_v11  ;;  %v997_v52 = vadd.f32 %v996_v15, %v898_v47 }
 0x326   :  { %v1023_v10 = vmul.f32 %v1015_v53, %v1005_v51 }
 0x327   :  { %v1028_v55 = vadd.f32 %v1026_v56, %v1020_v17  ;;  %v1021_v0 = vmul.f32 %v1013_v16, %v997_v52 }
 0x329   :  { %v1030_v3 = vadd.f32 %v1028_v55, %v1022_v57  ;;  %v1029_v21 = vadd.f32 %v1027_v62, %v1021_v0 }
 0x32b   :  { %v1031_v12 = vadd.f32 %v1029_v21, %v1023_v10  ;;  %v1034_v19 = vsub.f32 %v1030_v3, %v1032_v25 }
 0x32d   :  { %v1035_v24 = vsub.f32 %v1031_v12, %v1033_v23  ;;  %v1036_v27 = vand.u32 2147483647, %v1034_v19 }
 0x32f   :  { %v1037_v29 = vand.u32 2147483647, %v1035_v24  ;;  %v1039_v30 = vsel %vm1038_vm13, %v1036_v27, 0.0 }
 0x331   :  { %v1040_v43 = vsel %vm1038_vm13, %v1037_v29, 0.0 }
 0x332   :  { %v1041_v42 = vadd.f32 %v1040_v43, %v1039_v30 }
 0x334   :  { %1042 = vadd.xlane.f32.xlu1 %v1041_v42 }
 0x3c1   :  { %v1043_v45 = vpop.xlane.xlu1 %1042 }
 0x3c2   :  { %v1044_v31 = vrot.slane %v1043_v45, 4 }
 0x3c4   :  { %v1045_v32 = vadd.f32 %v1044_v31, %v1043_v45 }
 0x3c6   :  { %v1046_v9 = vrot.slane %v1045_v32, 2 }
 0x3c8   :  { %v1047_v33 = vadd.f32 %v1046_v9, %v1045_v32 }
 0x3ca   :  { %v1048_v36 = vrot.slane %v1047_v33, 1 }
 0x3cc   :  { %v1049_v38 = vadd.f32 %v1048_v36, %v1047_v33 }
 0x3ce   :  { %1107 = vpush %v1049_v38 }
 0x3ff   :  { %s1108_s30 = spop %1107 }
 0x400   :  { %v1051_v39 = vstv %s1108_s30 }
 0x401   :  { %v1053_v40 = vmul.f32 0.03125, %v1051_v39 }
 0x403   :  { %1055 = vst.msk [vmem:[#allocation4] sm:$0x1] %vm1054_vm14, %v1053_v40 }
 0x404   :  { %1258 = shalt.err (!%p1255_p4)
}
 0x405   :  { %s1259_s2 = scalar_lea.hbm %s1744_s8, 16 }
 0x406   :  { %p1260_p5 = scmp.ne.s32.totalorder %s1744_s8, %s1259_s2  ;;  %p1263_p6 = scmp.lt.u32.totalorder %s1259_s2, %s1744_s8 }
 0x408   :  { %p1265_p7 = pnand %p1263_p6, %p1260_p5 }
 0x40a   :  { %1268 = shalt.err (!%p1265_p7)
}
 0x40b   :  { %1065 = dma.vmem_to_hbm [thread:$0]  %s1063_s7, 16, %s1744_s8, [#allocation5]  }
 0x40c   :  { %1269 = dma.done.wait [#allocation5], 16  }
 0x40d   :  { %1270 = vsyncadd [#allocation5], 4294967280 }
 0x40e   :  { %1069 = vsyncpa [#allocation5], 1 }

</bundles_post_ra>
